<compile_context>
chip_gen: v7x
topology: tpu7x:2x2x1
jax: 0.10.0
libtpu: 0.0.40
codegen_flags: <defaults>
</compile_context>

<pallas_src>
import math
from functools import partial

import jax
import jax.numpy as jnp
from jax.experimental import pallas as pl
from jax.experimental.pallas import tpu as pltpu

C = 3.0                       # Poincare ball curvature (module hard-codes c=3)
SQRT_C = math.sqrt(C)
MIN_NORM = 1e-15              # geoopt clamp_min on norms / denominators
ATANH_EPS = 1e-7              # geoopt artanh clamp

LANE = 128                    # vreg lane width
SUBLANE = 8                   # vreg sublane count
TILE_B_MAX = 1024             # batch tile (rows per grid step)

_SQRT_2_OVER_PI = math.sqrt(2.0 / math.pi)


def _round_up(n, m):
    return ((n + m - 1) // m) * m


def _gelu_tanh(x):
    # tanh-approx GELU: transcendental goes to the EUP slot instead of a long VPU erf
    # polynomial.  Max deviation from PyTorch's exact erf GELU is ~1e-3 per activation.
    return 0.5 * x * (1.0 + jnp.tanh(_SQRT_2_OVER_PI * (x + 0.044715 * x * x * x)))


def _fused_kernel(x_ref, w1_ref, b1_ref, w2_ref, b2_ref, w3_ref, b3_ref,
                  pT_ref, x2_ref, bcoef_ref, ccx2_ref, o_ref, *, neg_inv_temp):
    # ---- MLP: fc1 -> GELU -> fc2 -> GELU -> fc3 (bf16 MXU operands, f32 accumulation) ----
    h = jnp.dot(x_ref[...], w1_ref[...], preferred_element_type=jnp.float32) + b1_ref[...]
    h = _gelu_tanh(h)
    h = jnp.dot(h.astype(jnp.bfloat16), w2_ref[...],
                preferred_element_type=jnp.float32) + b2_ref[...]
    h = _gelu_tanh(h)
    u = jnp.dot(h.astype(jnp.bfloat16), w3_ref[...],
                preferred_element_type=jnp.float32) + b3_ref[...]
    # u: (TILE_B, D_PAD) f32 Euclidean features; padded columns are exactly zero.

    # ---- expmap0: y = tanh(sqrt(c)*||u||) * u / (sqrt(c)*||u||) ----
    un = jnp.maximum(jnp.sqrt(jnp.sum(u * u, axis=-1, keepdims=True)), MIN_NORM)
    y = u * (jnp.tanh(SQRT_C * un) * pl.reciprocal(SQRT_C * un, approx=True))

    # ---- pairwise dist(p_j, y_i) = 2/sqrt(c) * artanh(sqrt(c)*||(-p_j) mobius+ y_i||) ----
    # With x = -p:  <x,y> = -<p,y>.  Per-prototype constants precomputed in the wrapper:
    #   x2_ref    = ||p||^2
    #   bcoef_ref = 1 - C*||p||^2
    #   ccx2_ref  = C^2*||p||^2
    xy = -jnp.dot(y, pT_ref[...], preferred_element_type=jnp.float32)   # (TILE_B, P_PAD)
    y2 = jnp.sum(y * y, axis=-1, keepdims=True)                         # (TILE_B, 1)
    x2 = x2_ref[...]                                                    # (1, P_PAD)
    b = bcoef_ref[...]

    a = 1.0 + 2.0 * C * xy + C * y2                                     # coeff on x
    denom = jnp.maximum(1.0 + 2.0 * C * xy + ccx2_ref[...] * y2, MIN_NORM)
    r = pl.reciprocal(denom, approx=True)
    r = r * (2.0 - denom * r)                        # one Newton step -> ~f32 accuracy
    num_sq = jnp.maximum(a * a * x2 + 2.0 * a * b * xy + b * b * y2, 0.0)
    mob_norm = jnp.sqrt(num_sq) * r

    z = jnp.clip(SQRT_C * mob_norm, 0.0, 1.0 - ATANH_EPS)
    # dist = (2/sqrt(c)) * artanh(z) = (1/sqrt(c)) * log((1+z)/(1-z))   (single log)
    dist = (1.0 / SQRT_C) * jnp.log((1.0 + z) * pl.reciprocal(1.0 - z, approx=True))
    o_ref[...] = dist * neg_inv_temp                                    # -dist / temp


def prepare_classifier(params, prototypes, num_genus, temp):
    """One-time weight/prototype preparation (padding, bf16 casts, per-proto constants)."""
    w1, b1, w2, b2, w3, b3 = params
    F, H = w1.shape
    D = w3.shape[1]                 # prototype_dim
    P = prototypes.shape[0]         # num_genus + num_species

    D_pad = _round_up(D, LANE)
    P_pad = _round_up(P, LANE)

    # Lane-pad minor dims to 128 (exact: zero cols don't change norms / dot products).
    w3p = jnp.zeros((H, D_pad), jnp.float32).at[:, :D].set(w3)
    b3p = jnp.zeros((1, D_pad), jnp.float32).at[:, :D].set(jnp.reshape(b3, (1, D)))
    protos = jnp.zeros((P_pad, D_pad), jnp.float32).at[:P, :D].set(prototypes)
    pT = protos.T                                       # (D_pad, P_pad)
    p2 = jnp.sum(protos * protos, axis=-1)[None, :]     # ||p||^2, (1, P_pad)

    return dict(
        w1=w1.astype(jnp.bfloat16), b1=jnp.reshape(b1, (1, H)).astype(jnp.float32),
        w2=w2.astype(jnp.bfloat16), b2=jnp.reshape(b2, (1, H)).astype(jnp.float32),
        w3=w3p.astype(jnp.bfloat16), b3=b3p,
        pT=pT, x2=p2, bcoef=1.0 - C * p2, ccx2=(C * C) * p2,
        F=F, H=H, D_pad=D_pad, P=P, P_pad=P_pad,
        num_genus=int(num_genus), neg_inv_temp=-1.0 / float(temp),
    )


def single_classifier_forward(x, prep, *, tile_b_max=TILE_B_MAX):
    """Fused forward: returns (genus_logits, species_logits)."""
    B, F = x.shape
    assert F == prep["F"]
    H, D_pad, P, P_pad = prep["H"], prep["D_pad"], prep["P"], prep["P_pad"]

    # Batch tiling: pad the tail only when needed so every tile is full (no masked /
    # OOB stores).  For B <= tile_b_max this is a single tile and (if B is a multiple
    # of 8) involves no input copy at all.
    B8 = _round_up(B, SUBLANE)
    tile_b = min(tile_b_max, B8)
    B_pad = _round_up(B8, tile_b)
    xp = x if B_pad == B else jnp.pad(x, ((0, B_pad - B), (0, 0)))
    xp = xp.astype(jnp.bfloat16)

    grid = (B_pad // tile_b,)
    const2 = lambda i: (0, 0)       # weights / prototypes: same block every step -> stay VMEM-resident

    logits_pad = pl.pallas_call(
        partial(_fused_kernel, neg_inv_temp=prep["neg_inv_temp"]),
        out_shape=jax.ShapeDtypeStruct((B_pad, P_pad), jnp.float32),
        grid=grid,
        in_specs=[
            pl.BlockSpec((tile_b, F), lambda i: (i, 0)),   # x batch tile
            pl.BlockSpec((F, H), const2),                  # w1
            pl.BlockSpec((1, H), const2),                  # b1
            pl.BlockSpec((H, H), const2),                  # w2
            pl.BlockSpec((1, H), const2),                  # b2
            pl.BlockSpec((H, D_pad), const2),              # w3 (lane-padded)
            pl.BlockSpec((1, D_pad), const2),              # b3
            pl.BlockSpec((D_pad, P_pad), const2),          # prototypes^T (lane-padded)
            pl.BlockSpec((1, P_pad), const2),              # ||p||^2
            pl.BlockSpec((1, P_pad), const2),              # 1 - C*||p||^2
            pl.BlockSpec((1, P_pad), const2),              # C^2*||p||^2
        ],
        out_specs=pl.BlockSpec((tile_b, P_pad), lambda i: (i, 0)),
        compiler_params=pltpu.CompilerParams(
            dimension_semantics=("parallel",)),            # megacore batch split on v7x
    )(xp, prep["w1"], prep["b1"], prep["w2"], prep["b2"], prep["w3"], prep["b3"],
      prep["pT"], prep["x2"], prep["bcoef"], prep["ccx2"])

    logits = logits_pad[:B, :P]
    ng = prep["num_genus"]
    return logits[:, :ng], logits[:, ng:]


# ---------------- pure-JAX reference (mirrors the kernel's numerics) ----------------
def _ref_forward(x, params, prototypes, num_genus, temp):
    w1, b1, w2, b2, w3, b3 = params
    xb = x.astype(jnp.bfloat16)
    w1b, w2b, w3b = (w.astype(jnp.bfloat16) for w in (w1, w2, w3))
    h = _gelu_tanh(jnp.dot(xb, w1b, preferred_element_type=jnp.float32) + b1.reshape(1, -1))
    h = _gelu_tanh(jnp.dot(h.astype(jnp.bfloat16), w2b,
                           preferred_element_type=jnp.float32) + b2.reshape(1, -1))
    f = jnp.dot(h.astype(jnp.bfloat16), w3b,
                preferred_element_type=jnp.float32) + b3.reshape(1, -1)

    un = jnp.maximum(jnp.linalg.norm(f, axis=-1, keepdims=True), MIN_NORM)
    y = jnp.tanh(SQRT_C * un) * f / (SQRT_C * un)
    xm = -prototypes[None, :, :]
    ym = y[:, None, :]
    xy = jnp.sum(xm * ym, -1)
    x2 = jnp.sum(xm * xm, -1)
    y2 = jnp.sum(ym * ym, -1)
    num = (1 + 2 * C * xy + C * y2)[..., None] * xm + (1 - C * x2)[..., None] * ym
    den = jnp.maximum(1 + 2 * C * xy + C * C * x2 * y2, MIN_NORM)
    nrm = jnp.linalg.norm(num / den[..., None], axis=-1)
    z = jnp.clip(SQRT_C * nrm, -1.0 + ATANH_EPS, 1.0 - ATANH_EPS)
    d = (2.0 / SQRT_C) * jnp.arctanh(z)
    logits = -d / temp
    return logits[:, :num_genus], logits[:, num_genus:]


if __name__ == "__main__":
    B, IN_F, HID, PROTO_DIM = 8, 32, 256, 16
    NUM_GENUS, NUM_SPECIES = 5, 11          # architecture = [num_genus, num_species]
    TEMP = 0.1

    key = jax.random.PRNGKey(0)
    ks = jax.random.split(key, 8)

    def lin_init(kw, kb, fan_in, fan_out):
        bound = 1.0 / math.sqrt(fan_in)     # PyTorch nn.Linear default init range
        w = jax.random.uniform(kw, (fan_in, fan_out), jnp.float32, -bound, bound)
        b = jax.random.uniform(kb, (1, fan_out), jnp.float32, -bound, bound)
        return w, b

    w1, b1 = lin_init(ks[0], ks[1], IN_F, HID)
    w2, b2 = lin_init(ks[2], ks[3], HID, HID)
    w3, b3 = lin_init(ks[4], ks[5], HID, PROTO_DIM)
    params = (w1, b1, w2, b2, w3, b3)

    # Prototypes: points inside the Poincare ball of curvature 3 (radius 1/sqrt(3)).
    prototypes = 0.05 * jax.random.normal(
        ks[6], (NUM_GENUS + NUM_SPECIES, PROTO_DIM), jnp.float32)
    x = jax.random.normal(ks[7], (B, IN_F), jnp.float32)

    # One-time weight/prototype preparation (hoisted out of the per-call path).
    prep = prepare_classifier(params, prototypes, num_genus=NUM_GENUS, temp=TEMP)
    prep = jax.tree_util.tree_map(
        lambda v: jax.block_until_ready(v) if isinstance(v, jax.Array) else v, prep)

    genus_logits, species_logits = single_classifier_forward(x, prep)
    jax.block_until_ready((genus_logits, species_logits))

    ref_g, ref_s = _ref_forward(x, params, prototypes, NUM_GENUS, TEMP)
    assert genus_logits.shape == (B, NUM_GENUS)
    assert species_logits.shape == (B, NUM_SPECIES)
    assert bool(jnp.all(jnp.isfinite(genus_logits)))
    assert bool(jnp.all(jnp.isfinite(species_logits)))
    # Tolerance accounts for EUP approx-reciprocals and bf16 MXU operand rounding.
    assert jnp.allclose(genus_logits, ref_g, rtol=1e-2, atol=1e-2), \
        float(jnp.max(jnp.abs(genus_logits - ref_g)))
    assert jnp.allclose(species_logits, ref_s, rtol=1e-2, atol=1e-2), \
        float(jnp.max(jnp.abs(species_logits - ref_s)))

    # TODO(synk): pred_fn / loss_fn (argmax, CrossEntropyLoss) are training/inference
    # utilities outside forward(); not implemented as kernels.
    print("KERNEL_OK")
</pallas_src>

<mosaic_0001>
module attributes {stable_mosaic.version = 11 : i64} {
  func.func @_fused_kernel(%arg0: i32, %arg1: memref<8x32xbf16, #tpu.memory_space<vmem>>, %arg2: memref<32x256xbf16, #tpu.memory_space<vmem>>, %arg3: memref<1x256xf32, #tpu.memory_space<vmem>>, %arg4: memref<256x256xbf16, #tpu.memory_space<vmem>>, %arg5: memref<1x256xf32, #tpu.memory_space<vmem>>, %arg6: memref<256x128xbf16, #tpu.memory_space<vmem>>, %arg7: memref<1x128xf32, #tpu.memory_space<vmem>>, %arg8: memref<128x128xf32, #tpu.memory_space<vmem>>, %arg9: memref<1x128xf32, #tpu.memory_space<vmem>>, %arg10: memref<1x128xf32, #tpu.memory_space<vmem>>, %arg11: memref<1x128xf32, #tpu.memory_space<vmem>>, %arg12: memref<8x128xf32, #tpu.memory_space<vmem>>) attributes {dimension_semantics = [#tpu.dimension_semantics<parallel>], iteration_bounds = array<i64: 1>, scalar_prefetch = 0 : i64, scratch_operands = 0 : i64, tpu.core_type = #tpu.core_type<tc>, window_params = [{transform_indices = @transform_0, window_bounds = array<i64: 8, 32>}, {pipeline_mode = #tpu.pipeline_mode<synchronous>, transform_indices = @transform_1, window_bounds = array<i64: 32, 256>}, {pipeline_mode = #tpu.pipeline_mode<synchronous>, transform_indices = @transform_2, window_bounds = array<i64: 1, 256>}, {pipeline_mode = #tpu.pipeline_mode<synchronous>, transform_indices = @transform_3, window_bounds = array<i64: 256, 256>}, {pipeline_mode = #tpu.pipeline_mode<synchronous>, transform_indices = @transform_4, window_bounds = array<i64: 1, 256>}, {pipeline_mode = #tpu.pipeline_mode<synchronous>, transform_indices = @transform_5, window_bounds = array<i64: 256, 128>}, {pipeline_mode = #tpu.pipeline_mode<synchronous>, transform_indices = @transform_6, window_bounds = array<i64: 1, 128>}, {pipeline_mode = #tpu.pipeline_mode<synchronous>, transform_indices = @transform_7, window_bounds = array<i64: 128, 128>}, {pipeline_mode = #tpu.pipeline_mode<synchronous>, transform_indices = @transform_8, window_bounds = array<i64: 1, 128>}, {pipeline_mode = #tpu.pipeline_mode<synchronous>, transform_indices = @transform_9, window_bounds = array<i64: 1, 128>}, {pipeline_mode = #tpu.pipeline_mode<synchronous>, transform_indices = @transform_10, window_bounds = array<i64: 1, 128>}, {transform_indices = @transform_11, window_bounds = array<i64: 8, 128>}]} {
    %c0 = arith.constant 0 : index
    %c0_0 = arith.constant 0 : index
    %0 = vector.load %arg1[%c0, %c0_0] : memref<8x32xbf16, #tpu.memory_space<vmem>>, vector<8x32xbf16>
    %c0_1 = arith.constant 0 : index
    %c0_2 = arith.constant 0 : index
    %1 = vector.load %arg2[%c0_1, %c0_2] : memref<32x256xbf16, #tpu.memory_space<vmem>>, vector<32x256xbf16>
    %cst = arith.constant dense<0.000000e+00> : vector<8x256xf32>
    %2 = tpu.matmul %0, %1, %cst {dimension_numbers = #tpu.dot_dimension_numbers<[1], [0], [0], [1], [0, 0, 1, 1], [], []>} : vector<8x32xbf16>, vector<32x256xbf16>, vector<8x256xf32> -> vector<8x256xf32>
    %c0_3 = arith.constant 0 : index
    %c0_4 = arith.constant 0 : index
    %3 = vector.load %arg3[%c0_3, %c0_4] : memref<1x256xf32, #tpu.memory_space<vmem>>, vector<1x256xf32>
    %4 = vector.broadcast %3 : vector<1x256xf32> to vector<8x256xf32>
    %5 = arith.addf %2, %4 : vector<8x256xf32>
    %cst_5 = arith.constant 5.000000e-01 : f32
    %6 = vector.broadcast %cst_5 : f32 to vector<8x256xf32>
    %7 = arith.mulf %6, %5 : vector<8x256xf32>
    %cst_6 = arith.constant 4.471500e-02 : f32
    %8 = vector.broadcast %cst_6 : f32 to vector<8x256xf32>
    %9 = arith.mulf %8, %5 : vector<8x256xf32>
    %10 = arith.mulf %9, %5 : vector<8x256xf32>
    %11 = arith.mulf %10, %5 : vector<8x256xf32>
    %12 = arith.addf %5, %11 : vector<8x256xf32>
    %cst_7 = arith.constant 0.797884583 : f32
    %13 = vector.broadcast %cst_7 : f32 to vector<8x256xf32>
    %14 = arith.mulf %13, %12 : vector<8x256xf32>
    %15 = math.tanh %14 : vector<8x256xf32>
    %cst_8 = arith.constant 1.000000e+00 : f32
    %16 = vector.broadcast %cst_8 : f32 to vector<8x256xf32>
    %17 = arith.addf %16, %15 : vector<8x256xf32>
    %18 = arith.mulf %7, %17 : vector<8x256xf32>
    %19 = arith.truncf %18 : vector<8x256xf32> to vector<8x256xbf16>
    %c0_9 = arith.constant 0 : index
    %c0_10 = arith.constant 0 : index
    %20 = vector.load %arg4[%c0_9, %c0_10] : memref<256x256xbf16, #tpu.memory_space<vmem>>, vector<256x256xbf16>
    %cst_11 = arith.constant dense<0.000000e+00> : vector<8x256xf32>
    %21 = tpu.matmul %19, %20, %cst_11 {dimension_numbers = #tpu.dot_dimension_numbers<[1], [0], [0], [1], [0, 0, 1, 1], [], []>} : vector<8x256xbf16>, vector<256x256xbf16>, vector<8x256xf32> -> vector<8x256xf32>
    %c0_12 = arith.constant 0 : index
    %c0_13 = arith.constant 0 : index
    %22 = vector.load %arg5[%c0_12, %c0_13] : memref<1x256xf32, #tpu.memory_space<vmem>>, vector<1x256xf32>
    %23 = vector.broadcast %22 : vector<1x256xf32> to vector<8x256xf32>
    %24 = arith.addf %21, %23 : vector<8x256xf32>
    %cst_14 = arith.constant 5.000000e-01 : f32
    %25 = vector.broadcast %cst_14 : f32 to vector<8x256xf32>
    %26 = arith.mulf %25, %24 : vector<8x256xf32>
    %cst_15 = arith.constant 4.471500e-02 : f32
    %27 = vector.broadcast %cst_15 : f32 to vector<8x256xf32>
    %28 = arith.mulf %27, %24 : vector<8x256xf32>
    %29 = arith.mulf %28, %24 : vector<8x256xf32>
    %30 = arith.mulf %29, %24 : vector<8x256xf32>
    %31 = arith.addf %24, %30 : vector<8x256xf32>
    %cst_16 = arith.constant 0.797884583 : f32
    %32 = vector.broadcast %cst_16 : f32 to vector<8x256xf32>
    %33 = arith.mulf %32, %31 : vector<8x256xf32>
    %34 = math.tanh %33 : vector<8x256xf32>
    %cst_17 = arith.constant 1.000000e+00 : f32
    %35 = vector.broadcast %cst_17 : f32 to vector<8x256xf32>
    %36 = arith.addf %35, %34 : vector<8x256xf32>
    %37 = arith.mulf %26, %36 : vector<8x256xf32>
    %38 = arith.truncf %37 : vector<8x256xf32> to vector<8x256xbf16>
    %c0_18 = arith.constant 0 : index
    %c0_19 = arith.constant 0 : index
    %39 = vector.load %arg6[%c0_18, %c0_19] : memref<256x128xbf16, #tpu.memory_space<vmem>>, vector<256x128xbf16>
    %cst_20 = arith.constant dense<0.000000e+00> : vector<8x128xf32>
    %40 = tpu.matmul %38, %39, %cst_20 {dimension_numbers = #tpu.dot_dimension_numbers<[1], [0], [0], [1], [0, 0, 1, 1], [], []>} : vector<8x256xbf16>, vector<256x128xbf16>, vector<8x128xf32> -> vector<8x128xf32>
    %c0_21 = arith.constant 0 : index
    %c0_22 = arith.constant 0 : index
    %41 = vector.load %arg7[%c0_21, %c0_22] : memref<1x128xf32, #tpu.memory_space<vmem>>, vector<1x128xf32>
    %42 = vector.broadcast %41 : vector<1x128xf32> to vector<8x128xf32>
    %43 = arith.addf %40, %42 : vector<8x128xf32>
    %44 = arith.mulf %43, %43 : vector<8x128xf32>
    %cst_23 = arith.constant dense<0.000000e+00> : vector<8xf32>
    %45 = vector.multi_reduction <add>, %44, %cst_23 [1] : vector<8x128xf32> to vector<8xf32>
    %46 = vector.shape_cast %45 : vector<8xf32> to vector<8x1xf32>
    %47 = math.sqrt %46 : vector<8x1xf32>
    %cst_24 = arith.constant 1.000000e-15 : f32
    %48 = vector.broadcast %cst_24 : f32 to vector<8x1xf32>
    %49 = arith.maximumf %47, %48 : vector<8x1xf32>
    %cst_25 = arith.constant 1.73205078 : f32
    %50 = vector.broadcast %cst_25 : f32 to vector<8x1xf32>
    %51 = arith.mulf %50, %49 : vector<8x1xf32>
    %52 = math.tanh %51 : vector<8x1xf32>
    %cst_26 = arith.constant 1.73205078 : f32
    %53 = vector.broadcast %cst_26 : f32 to vector<8x1xf32>
    %54 = arith.mulf %53, %49 : vector<8x1xf32>
    %55 = tpu.reciprocal %54 {approx = true} : vector<8x1xf32> -> vector<8x1xf32>
    %56 = arith.mulf %52, %55 : vector<8x1xf32>
    %57 = vector.broadcast %56 : vector<8x1xf32> to vector<8x128xf32>
    %58 = arith.mulf %43, %57 : vector<8x128xf32>
    %c0_27 = arith.constant 0 : index
    %c0_28 = arith.constant 0 : index
    %59 = vector.load %arg8[%c0_27, %c0_28] : memref<128x128xf32, #tpu.memory_space<vmem>>, vector<128x128xf32>
    %cst_29 = arith.constant dense<0.000000e+00> : vector<8x128xf32>
    %60 = tpu.matmul %58, %59, %cst_29 {dimension_numbers = #tpu.dot_dimension_numbers<[1], [0], [0], [1], [0, 0, 1, 1], [], []>} : vector<8x128xf32>, vector<128x128xf32>, vector<8x128xf32> -> vector<8x128xf32>
    %cst_30 = arith.constant 0.000000e+00 : f32
    %61 = vector.broadcast %cst_30 : f32 to vector<8x128xf32>
    %62 = arith.subf %61, %60 : vector<8x128xf32>
    %63 = arith.mulf %58, %58 : vector<8x128xf32>
    %cst_31 = arith.constant dense<0.000000e+00> : vector<8xf32>
    %64 = vector.multi_reduction <add>, %63, %cst_31 [1] : vector<8x128xf32> to vector<8xf32>
    %65 = vector.shape_cast %64 : vector<8xf32> to vector<8x1xf32>
    %c0_32 = arith.constant 0 : index
    %c0_33 = arith.constant 0 : index
    %66 = vector.load %arg9[%c0_32, %c0_33] : memref<1x128xf32, #tpu.memory_space<vmem>>, vector<1x128xf32>
    %c0_34 = arith.constant 0 : index
    %c0_35 = arith.constant 0 : index
    %67 = vector.load %arg10[%c0_34, %c0_35] : memref<1x128xf32, #tpu.memory_space<vmem>>, vector<1x128xf32>
    %cst_36 = arith.constant 6.000000e+00 : f32
    %68 = vector.broadcast %cst_36 : f32 to vector<8x128xf32>
    %69 = arith.mulf %68, %62 : vector<8x128xf32>
    %cst_37 = arith.constant 1.000000e+00 : f32
    %70 = vector.broadcast %cst_37 : f32 to vector<8x128xf32>
    %71 = arith.addf %70, %69 : vector<8x128xf32>
    %cst_38 = arith.constant 3.000000e+00 : f32
    %72 = vector.broadcast %cst_38 : f32 to vector<8x1xf32>
    %73 = arith.mulf %72, %65 : vector<8x1xf32>
    %74 = vector.broadcast %73 : vector<8x1xf32> to vector<8x128xf32>
    %75 = arith.addf %71, %74 : vector<8x128xf32>
    %cst_39 = arith.constant 6.000000e+00 : f32
    %76 = vector.broadcast %cst_39 : f32 to vector<8x128xf32>
    %77 = arith.mulf %76, %62 : vector<8x128xf32>
    %cst_40 = arith.constant 1.000000e+00 : f32
    %78 = vector.broadcast %cst_40 : f32 to vector<8x128xf32>
    %79 = arith.addf %78, %77 : vector<8x128xf32>
    %c0_41 = arith.constant 0 : index
    %c0_42 = arith.constant 0 : index
    %80 = vector.load %arg11[%c0_41, %c0_42] : memref<1x128xf32, #tpu.memory_space<vmem>>, vector<1x128xf32>
    %81 = vector.broadcast %80 : vector<1x128xf32> to vector<8x128xf32>
    %82 = vector.broadcast %65 : vector<8x1xf32> to vector<8x128xf32>
    %83 = arith.mulf %81, %82 : vector<8x128xf32>
    %84 = arith.addf %79, %83 : vector<8x128xf32>
    %cst_43 = arith.constant 1.000000e-15 : f32
    %85 = vector.broadcast %cst_43 : f32 to vector<8x128xf32>
    %86 = arith.maximumf %84, %85 : vector<8x128xf32>
    %87 = tpu.reciprocal %86 {approx = true} : vector<8x128xf32> -> vector<8x128xf32>
    %88 = arith.mulf %86, %87 : vector<8x128xf32>
    %cst_44 = arith.constant 2.000000e+00 : f32
    %89 = vector.broadcast %cst_44 : f32 to vector<8x128xf32>
    %90 = arith.subf %89, %88 : vector<8x128xf32>
    %91 = arith.mulf %87, %90 : vector<8x128xf32>
    %92 = arith.mulf %75, %75 : vector<8x128xf32>
    %93 = vector.broadcast %66 : vector<1x128xf32> to vector<8x128xf32>
    %94 = arith.mulf %92, %93 : vector<8x128xf32>
    %cst_45 = arith.constant 2.000000e+00 : f32
    %95 = vector.broadcast %cst_45 : f32 to vector<8x128xf32>
    %96 = arith.mulf %95, %75 : vector<8x128xf32>
    %97 = vector.broadcast %67 : vector<1x128xf32> to vector<8x128xf32>
    %98 = arith.mulf %96, %97 : vector<8x128xf32>
    %99 = arith.mulf %98, %62 : vector<8x128xf32>
    %100 = arith.addf %94, %99 : vector<8x128xf32>
    %101 = arith.mulf %67, %67 : vector<1x128xf32>
    %102 = vector.broadcast %101 : vector<1x128xf32> to vector<8x128xf32>
    %103 = vector.broadcast %65 : vector<8x1xf32> to vector<8x128xf32>
    %104 = arith.mulf %102, %103 : vector<8x128xf32>
    %105 = arith.addf %100, %104 : vector<8x128xf32>
    %cst_46 = arith.constant 0.000000e+00 : f32
    %106 = vector.broadcast %cst_46 : f32 to vector<8x128xf32>
    %107 = arith.maximumf %105, %106 : vector<8x128xf32>
    %108 = math.sqrt %107 : vector<8x128xf32>
    %109 = arith.mulf %108, %91 : vector<8x128xf32>
    %cst_47 = arith.constant 1.73205078 : f32
    %110 = vector.broadcast %cst_47 : f32 to vector<8x128xf32>
    %111 = arith.mulf %110, %109 : vector<8x128xf32>
    %cst_48 = arith.constant 0.000000e+00 : f32
    %cst_49 = arith.constant 0.99999988 : f32
    %112 = vector.broadcast %cst_48 : f32 to vector<8x128xf32>
    %113 = arith.maximumf %112, %111 : vector<8x128xf32>
    %114 = vector.broadcast %cst_49 : f32 to vector<8x128xf32>
    %115 = arith.minimumf %114, %113 : vector<8x128xf32>
    %cst_50 = arith.constant 1.000000e+00 : f32
    %116 = vector.broadcast %cst_50 : f32 to vector<8x128xf32>
    %117 = arith.addf %116, %115 : vector<8x128xf32>
    %cst_51 = arith.constant 1.000000e+00 : f32
    %118 = vector.broadcast %cst_51 : f32 to vector<8x128xf32>
    %119 = arith.subf %118, %115 : vector<8x128xf32>
    %120 = tpu.reciprocal %119 {approx = true} : vector<8x128xf32> -> vector<8x128xf32>
    %121 = arith.mulf %117, %120 : vector<8x128xf32>
    %122 = math.log %121 : vector<8x128xf32>
    %cst_52 = arith.constant 0.577350259 : f32
    %123 = vector.broadcast %cst_52 : f32 to vector<8x128xf32>
    %124 = arith.mulf %123, %122 : vector<8x128xf32>
    %cst_53 = arith.constant -1.000000e+01 : f32
    %125 = vector.broadcast %cst_53 : f32 to vector<8x128xf32>
    %126 = arith.mulf %124, %125 : vector<8x128xf32>
    %c0_54 = arith.constant 0 : index
    %c0_55 = arith.constant 0 : index
    %127 = vector.load %arg12[%c0_54, %c0_55] : memref<8x128xf32, #tpu.memory_space<vmem>>, vector<8x128xf32>
    tpu.vector_store %arg12[%c0_54, %c0_55], %126 {strides = array<i32>} : memref<8x128xf32, #tpu.memory_space<vmem>>, vector<8x128xf32>,
    return
  }
  func.func @transform_0(%arg0: i32) -> (i32, i32) {
    %c0_i32 = arith.constant 0 : i32
    %c0_i32_0 = arith.constant 0 : i32
    return %arg0, %c0_i32 : i32, i32
  }
  func.func @transform_1(%arg0: i32) -> (i32, i32) {
    %c0_i32 = arith.constant 0 : i32
    %c0_i32_0 = arith.constant 0 : i32
    %c0_i32_1 = arith.constant 0 : i32
    return %c0_i32, %c0_i32_0 : i32, i32
  }
  func.func @transform_2(%arg0: i32) -> (i32, i32) {
    %c0_i32 = arith.constant 0 : i32
    %c0_i32_0 = arith.constant 0 : i32
    %c0_i32_1 = arith.constant 0 : i32
    return %c0_i32, %c0_i32_0 : i32, i32
  }
  func.func @transform_3(%arg0: i32) -> (i32, i32) {
    %c0_i32 = arith.constant 0 : i32
    %c0_i32_0 = arith.constant 0 : i32
    %c0_i32_1 = arith.constant 0 : i32
    return %c0_i32, %c0_i32_0 : i32, i32
  }
  func.func @transform_4(%arg0: i32) -> (i32, i32) {
    %c0_i32 = arith.constant 0 : i32
    %c0_i32_0 = arith.constant 0 : i32
    %c0_i32_1 = arith.constant 0 : i32
    return %c0_i32, %c0_i32_0 : i32, i32
  }
  func.func @transform_5(%arg0: i32) -> (i32, i32) {
    %c0_i32 = arith.constant 0 : i32
    %c0_i32_0 = arith.constant 0 : i32
    %c0_i32_1 = arith.constant 0 : i32
    return %c0_i32, %c0_i32_0 : i32, i32
  }
  func.func @transform_6(%arg0: i32) -> (i32, i32) {
    %c0_i32 = arith.constant 0 : i32
    %c0_i32_0 = arith.constant 0 : i32
    %c0_i32_1 = arith.constant 0 : i32
    return %c0_i32, %c0_i32_0 : i32, i32
  }
  func.func @transform_7(%arg0: i32) -> (i32, i32) {
    %c0_i32 = arith.constant 0 : i32
    %c0_i32_0 = arith.constant 0 : i32
    %c0_i32_1 = arith.constant 0 : i32
    return %c0_i32, %c0_i32_0 : i32, i32
  }
  func.func @transform_8(%arg0: i32) -> (i32, i32) {
    %c0_i32 = arith.constant 0 : i32
    %c0_i32_0 = arith.constant 0 : i32
    %c0_i32_1 = arith.constant 0 : i32
    return %c0_i32, %c0_i32_0 : i32, i32
  }
  func.func @transform_9(%arg0: i32) -> (i32, i32) {
    %c0_i32 = arith.constant 0 : i32
    %c0_i32_0 = arith.constant 0 : i32
    %c0_i32_1 = arith.constant 0 : i32
    return %c0_i32, %c0_i32_0 : i32, i32
  }
  func.func @transform_10(%arg0: i32) -> (i32, i32) {
    %c0_i32 = arith.constant 0 : i32
    %c0_i32_0 = arith.constant 0 : i32
    %c0_i32_1 = arith.constant 0 : i32
    return %c0_i32, %c0_i32_0 : i32, i32
  }
  func.func @transform_11(%arg0: i32) -> (i32, i32) {
    %c0_i32 = arith.constant 0 : i32
    %c0_i32_0 = arith.constant 0 : i32
    return %arg0, %c0_i32 : i32, i32
  }
}

</mosaic_0001>

<bundles_post_ra>
// kernel: tpu_custom_call.1
= control target key start
LH: loop header
LB: loop body
LE: loop exit
PB: predicated region body
PF: predicated region fallthrough
CT: control target
= control target key end

     0   :  { %16 = vsyncpa [#allocation3], 0  ;;  %s1438_s0 = inlined_call_operand.hbm [shape: bf16[8,32], index: 0, kind: input, shape index: {}]   ;;  %s1439_s1 = inlined_call_operand.hbm [shape: bf16[32,256], index: 1, kind: input, shape index: {}]   ;;  %s1440_s2 = inlined_call_operand.vmem [shape: f32[1,256], index: 2, kind: input, shape index: {}]   ;;  %s1441_s3 = inlined_call_operand.hbm [shape: bf16[256,256], index: 3, kind: input, shape index: {}]   ;;  %s1442_s4 = inlined_call_operand.vmem [shape: f32[1,256], index: 4, kind: input, shape index: {}]   ;;  %s1443_s5 = inlined_call_operand.hbm [shape: bf16[256,128], index: 5, kind: input, shape index: {}]   ;;  %s1444_s6 = inlined_call_operand.vmem [shape: f32[1,128], index: 6, kind: input, shape index: {}]   ;;  %s1445_s7 = inlined_call_operand.hbm [shape: f32[128,128], index: 7, kind: input, shape index: {}]   ;;  %s1446_s8 = inlined_call_operand.vmem [shape: f32[1,128], index: 8, kind: input, shape index: {}]   ;;  %s1447_s9 = inlined_call_operand.vmem [shape: f32[1,128], index: 9, kind: input, shape index: {}]   ;;  %s1448_s10 = inlined_call_operand.vmem [shape: f32[1,128], index: 10, kind: input, shape index: {}]   ;;  %s1449_s11 = inlined_call_operand.hbm [shape: f32[8,128], index: 11, kind: output, shape index: {}]  }
   0x1   :  { %17 = vsyncpa [#allocation6], 0 }
   0x2   :  { %18 = vsyncpa [#allocation9], 0 }
   0x3   :  { %19 = vsyncpa [#allocation4], 0  ;;  %s1239_s17 = smov [#allocation5]   ;;  %s1099_s21 = scalar_lea.hbm %s1439_s1, 512 }
   0x4   :  { %s35_s18 = sshll.u32 %s1239_s17, 4  ;;  %p1100_p0 = scmp.ne.s32.totalorder %s1439_s1, %s1099_s21  ;;  %s36_s18 = int_to_ptr.vmem [resolvable:$true] %s35_s18 }
   0x5   :  { %p1103_p1 = scmp.lt.u32.totalorder %s1099_s21, %s1439_s1 }
   0x7   :  { %p1105_p2 = pnand %p1103_p1, %p1100_p0 }
   0x9   :  { %1108 = shalt.err (!%p1105_p2)
}
   0xa   :  { %s1109_s26 = scalar_lea.vmem %s36_s18, 512  ;;  %p1114_p4 = scmp.lt.s32.totalorder %s36_s18, %s36_s18 }
   0xb   :  { %p1110_p3 = scmp.ne.s32.totalorder %s36_s18, %s1109_s26  ;;  %p1115_p5 = scmp.lt.s32.totalorder %s1109_s26, %s1109_s26 }
   0xd   :  { %p1116_p6 = por %p1115_p5, %p1114_p4 }
   0xf   :  { %p1117_p7 = pnand %p1116_p6, %p1110_p3 }
  0x11   :  { %1120 = shalt.err (!%p1117_p7)
}
  0x12   :  { %s1240_s27 = smov 128   ;;  %s1241_s28 = smov 8  }
  0x13   :  { %41 = dma.hbm_to_vmem [thread:$0]  %s1439_s1, 512, %s36_s18, [#allocation6], %s1240_s27, %s1240_s27, %s1241_s28  }
  0x14   :  { %s1242_s12 = smov [#allocation8]   ;;  %s1121_s16 = scalar_lea.hbm %s1443_s5, 2048 }
  0x15   :  { %s63_s13 = sshll.u32 %s1242_s12, 4  ;;  %p1122_p8 = scmp.ne.s32.totalorder %s1443_s5, %s1121_s16  ;;  %s64_s13 = int_to_ptr.vmem [resolvable:$true] %s63_s13 }
  0x16   :  { %p1125_p9 = scmp.lt.u32.totalorder %s1121_s16, %s1443_s5 }
  0x18   :  { %p1127_p10 = pnand %p1125_p9, %p1122_p8 }
  0x1a   :  { %1130 = shalt.err (!%p1127_p10)
}
  0x1b   :  { %s1131_s22 = scalar_lea.vmem %s64_s13, 2048  ;;  %p1136_p12 = scmp.lt.s32.totalorder %s64_s13, %s64_s13 }
  0x1c   :  { %p1132_p11 = scmp.ne.s32.totalorder %s64_s13, %s1131_s22  ;;  %p1137_p13 = scmp.lt.s32.totalorder %s1131_s22, %s1131_s22 }
  0x1e   :  { %p1138_p0 = por %p1137_p13, %p1136_p12 }
  0x20   :  { %p1139_p1 = pnand %p1138_p0, %p1132_p11 }
  0x22   :  { %1142 = shalt.err (!%p1139_p1)
}
  0x23   :  { %s1243_s1 = smov 64   ;;  %s1244_s18 = smov 4  }
  0x24   :  { %69 = dma.hbm_to_vmem [thread:$0]  %s1443_s5, 2048, %s64_s13, [#allocation9], %s1243_s1, %s1243_s1, %s1244_s18  }
  0x25   :  { %s1245_s25 = smov [#allocation2]   ;;  %s1246_s29 = smov [#allocation7]  }
  0x26   :  { %s26_s26 = sshll.u32 %s1245_s25, 4  ;;  %s49_s30 = sshll.u32 %s1246_s29, 4  ;;  %s27_s26 = int_to_ptr.vmem [resolvable:$true] %s26_s26  ;;  %s1340_s30 = int_to_ptr.vmem [resolvable:$true] %s49_s30 }
  0x27   :  { %s1143_s15 = scalar_lea.hbm %s1438_s0, 64 }
  0x28   :  { %p1144_p2 = scmp.ne.s32.totalorder %s1438_s0, %s1143_s15  ;;  %p1147_p3 = scmp.lt.u32.totalorder %s1143_s15, %s1438_s0 }
  0x2a   :  { %p1149_p4 = pnand %p1147_p3, %p1144_p2 }
  0x2c   :  { %1152 = shalt.err (!%p1149_p4)
}
  0x2d   :  { %s1153_s5 = scalar_lea.vmem %s27_s26, 64  ;;  %p1158_p6 = scmp.lt.s32.totalorder %s27_s26, %s27_s26 }
  0x2e   :  { %p1154_p5 = scmp.ne.s32.totalorder %s27_s26, %s1153_s5  ;;  %p1159_p7 = scmp.lt.s32.totalorder %s1153_s5, %s1153_s5 }
  0x30   :  { %p1160_p8 = por %p1159_p7, %p1158_p6 }
  0x32   :  { %p1161_p9 = pnand %p1160_p8, %p1154_p5 }
  0x34   :  { %1164 = shalt.err (!%p1161_p9)
}
  0x35   :  { %29 = dma.hbm_to_vmem [thread:$0]  %s1438_s0, 64, %s27_s26, [#allocation3]  }
  0x36   :  { %s1165_s18 = scalar_lea.hbm %s1441_s3, 4096 }
  0x37   :  { %p1166_p10 = scmp.ne.s32.totalorder %s1441_s3, %s1165_s18  ;;  %p1169_p11 = scmp.lt.u32.totalorder %s1165_s18, %s1441_s3 }
  0x39   :  { %p1171_p12 = pnand %p1169_p11, %p1166_p10 }
  0x3b   :  { %1174 = shalt.err (!%p1171_p12)
}
  0x3c   :  { %s1175_s12 = scalar_lea.vmem %s1340_s30, 4096  ;;  %p1180_p0 = scmp.lt.s32.totalorder %s1340_s30, %s1340_s30 }
  0x3d   :  { %p1176_p13 = scmp.ne.s32.totalorder %s1340_s30, %s1175_s12  ;;  %p1181_p1 = scmp.lt.s32.totalorder %s1175_s12, %s1175_s12 }
  0x3f   :  { %p1182_p2 = por %p1181_p1, %p1180_p0 }
  0x41   :  { %p1183_p3 = pnand %p1182_p2, %p1176_p13 }
  0x43   :  { %1186 = shalt.err (!%p1183_p3)
}
  0x44   :  { %55 = dma.hbm_to_vmem [thread:$0]  %s1441_s3, 4096, %s1340_s30, [#allocation6], %s1240_s27, %s1240_s27, %s1241_s28  }
  0x45   :  { %s1247_s14 = smov [#allocation10]   ;;  %s1187_s19 = scalar_lea.hbm %s1445_s7, 2048 }
  0x46   :  { %s77_s15 = sshll.u32 %s1247_s14, 4  ;;  %p1188_p4 = scmp.ne.s32.totalorder %s1445_s7, %s1187_s19  ;;  %s78_s15 = int_to_ptr.vmem [resolvable:$true] %s77_s15 }
  0x47   :  { %p1191_p5 = scmp.lt.u32.totalorder %s1187_s19, %s1445_s7 }
  0x49   :  { %p1193_p6 = pnand %p1191_p5, %p1188_p4 }
  0x4b   :  { %1196 = shalt.err (!%p1193_p6)
}
  0x4c   :  { %s1197_s22 = scalar_lea.vmem %s78_s15, 2048  ;;  %p1202_p8 = scmp.lt.s32.totalorder %s78_s15, %s78_s15 }
  0x4d   :  { %p1198_p7 = scmp.ne.s32.totalorder %s78_s15, %s1197_s22  ;;  %p1203_p9 = scmp.lt.s32.totalorder %s1197_s22, %s1197_s22 }
  0x4f   :  { %p1204_p10 = por %p1203_p9, %p1202_p8 }
  0x51   :  { %p1205_p11 = pnand %p1204_p10, %p1198_p7 }
  0x53   :  { %1208 = shalt.err (!%p1205_p11)
}
  0x54   :  { %83 = dma.hbm_to_vmem [thread:$0]  %s1445_s7, 2048, %s78_s15, [#allocation9], %s1240_s27, %s1240_s27, %s1241_s28  }
  0x55   :  { %1231 = dma.done.wait [#allocation3], 64  }
  0x56   :  { %1232 = vsyncadd [#allocation3], 4294967232 }
  0x57   :  { %1233 = dma.done.wait [#allocation6], 4608  }
  0x58   :  { %1234 = vsyncadd [#allocation6], 4294962688 }
  0x59   :  { %1235 = dma.done.wait [#allocation9], 4096  }
  0x5a   :  { %1236 = vsyncadd [#allocation9], 4294963200  ;;  %v1248_v0 = vmov 0   ;;  %v1007_v1 = vld [vmem:[#allocation5 + $0x4] ss:$8 sps:$4 sm:$0xff]   ;;  %vm143_vm0 = vcmask 261120   ;;  %v113_v38 = vlaneseq }
  0x5b   :  { %179 = vmatprep.mubr.bf16.mxu0 %v1248_v0  ;;  %v1009_v2 = vld [vmem:[#allocation5] ss:$8 sps:$4 sm:$0xff]   ;;  %147 = vmatprep.subr.bf16.mxu0 %v1007_v1  ;;  %v1010_v3 = vld [vmem:[#allocation5 + $0x14] ss:$8 sps:$4 sm:$0xff]   ;;  %v1012_v4 = vld [vmem:[#allocation5 + $0x10] ss:$8 sps:$4 sm:$0xff]  }
  0x5c   :  { %148 = vmatpush1.bf16.msra.mxu0 %v1009_v2  ;;  %v1013_v5 = vld [vmem:[#allocation7 + $0x4] ss:$8 sps:$4 sm:$0xff]   ;;  %v1015_v6 = vld [vmem:[#allocation7] ss:$8 sps:$4 sm:$0xff]   ;;  %v1016_v7 = vld [vmem:[#allocation7 + $0x14] ss:$8 sps:$4 sm:$0xff]  }
  0x5d   :  { %149 = vmatprep.subr.bf16.mxu0 %v1010_v3  ;;  %412 = vmatprep.subr.bf16.mxu1 %v1013_v5  ;;  %v106_v8 = vld [vmem:[#allocation2] sm:$0xf]  ;;  %v1018_v9 = vld [vmem:[#allocation7 + $0x10] ss:$8 sps:$4 sm:$0xff]   ;;  %v1019_v10 = vld [vmem:[#allocation7 + $0x24] ss:$8 sps:$4 sm:$0xff]  }
  0x5e   :  { %413 = vmatpush1.bf16.msra.mxu1 %v1015_v6  ;;  %v1021_v11 = vld [vmem:[#allocation7 + $0x20] ss:$8 sps:$4 sm:$0xff]   ;;  %v1022_v12 = vld [vmem:[#allocation7 + $0x34] ss:$8 sps:$4 sm:$0xff]   ;;  %v1024_v13 = vld [vmem:[#allocation7 + $0x30] ss:$8 sps:$4 sm:$0xff]  }
  0x5f   :  { %414 = vmatprep.subr.bf16.mxu1 %v1016_v7  ;;  %v1025_v14 = vld [vmem:[#allocation7 + $0x44] ss:$8 sps:$4 sm:$0xff]   ;;  %v1027_v15 = vld [vmem:[#allocation7 + $0x40] ss:$8 sps:$4 sm:$0xff]   ;;  %v1028_v16 = vld [vmem:[#allocation7 + $0x54] ss:$8 sps:$4 sm:$0xff]  }
  0x60   :  { %150 = vmatpush1.bf16.msra.mxu0 %v1012_v4  ;;  %v1030_v17 = vld [vmem:[#allocation7 + $0x50] ss:$8 sps:$4 sm:$0xff]   ;;  %v1031_v18 = vld [vmem:[#allocation7 + $0x64] ss:$8 sps:$4 sm:$0xff]   ;;  %v1033_v19 = vld [vmem:[#allocation7 + $0x60] ss:$8 sps:$4 sm:$0xff]  }
  0x61   :  { %v1034_v20 = vld [vmem:[#allocation7 + $0x74] ss:$8 sps:$4 sm:$0xff]   ;;  %v1036_v21 = vld [vmem:[#allocation7 + $0x70] ss:$8 sps:$4 sm:$0xff]   ;;  %v1037_v22 = vld [vmem:[#allocation7 + $0x84] ss:$8 sps:$4 sm:$0xff]  }
  0x62   :  { %415 = vmatpush1.bf16.msra.mxu1 %v1018_v9  ;;  %v1039_v23 = vld [vmem:[#allocation7 + $0x80] ss:$8 sps:$4 sm:$0xff]   ;;  %v1040_v24 = vld [vmem:[#allocation7 + $0x94] ss:$8 sps:$4 sm:$0xff]   ;;  %v1042_v25 = vld [vmem:[#allocation7 + $0x90] ss:$8 sps:$4 sm:$0xff]  }
  0x63   :  { %843 = vmatmul.mubr.msk.bf16.vlgmr.msra.gmra.mrb[0].mxu0 %vm143_vm0, %v106_v8  ;;  %416 = vmatprep.subr.bf16.mxu1 %v1019_v10  ;;  %v1043_v26 = vld [vmem:[#allocation7 + $0xa4] ss:$8 sps:$4 sm:$0xff]   ;;  %v1045_v27 = vld [vmem:[#allocation7 + $0xa0] ss:$8 sps:$4 sm:$0xff]   ;;  %v1046_v28 = vld [vmem:[#allocation7 + $0xb4] ss:$8 sps:$4 sm:$0xff]  }
  0x64   :  { %v1048_v29 = vld [vmem:[#allocation7 + $0xb0] ss:$8 sps:$4 sm:$0xff]   ;;  %v1049_v30 = vld [vmem:[#allocation7 + $0xc4] ss:$8 sps:$4 sm:$0xff]   ;;  %v1051_v31 = vld [vmem:[#allocation7 + $0xc0] ss:$8 sps:$4 sm:$0xff]  }
  0x65   :  { %v1052_v32 = vld [vmem:[#allocation7 + $0xd4] ss:$8 sps:$4 sm:$0xff]   ;;  %v1054_v33 = vld [vmem:[#allocation7 + $0xd0] ss:$8 sps:$4 sm:$0xff]   ;;  %v1055_v34 = vld [vmem:[#allocation7 + $0xe4] ss:$8 sps:$4 sm:$0xff]  }
  0x66   :  { %417 = vmatpush1.bf16.msra.mxu1 %v1021_v11  ;;  %v1057_v35 = vld [vmem:[#allocation7 + $0xe0] ss:$8 sps:$4 sm:$0xff]   ;;  %v1058_v36 = vld [vmem:[#allocation7 + $0xf4] ss:$8 sps:$4 sm:$0xff]   ;;  %v1060_v37 = vld [vmem:[#allocation7 + $0xf0] ss:$8 sps:$4 sm:$0xff]  }
  0x67   :  { %418 = vmatprep.subr.bf16.mxu1 %v1022_v12  ;;  %v1389_v39 = vshrl.u32 %v113_v38, 7  ;;  %v111_v41 = vld [vmem:[%s1440_s2] sm:$0x3]  ;;  %v1061_v7 = vld [vmem:[#allocation8 + $0x40] sm:$0xff]   ;;  %v1063_v9 = vld [vmem:[#allocation8 + $0x48] sm:$0xff]   ;;  %vm1250_vm1 = vmmov 0  }
  0x68   :  { %v1062_v8 = vld [vmem:[#allocation8] sm:$0xff]   ;;  %895 = vmatprep.subr.bf16.mxu0 %v1061_v7  ;;  %v1064_v10 = vld [vmem:[#allocation8 + $0x8] sm:$0xff]   ;;  %v1065_v11 = vld [vmem:[#allocation8 + $0x50] sm:$0xff]  }
  0x69   :  { %v1392_v40 = vsub.s32 0, %v1389_v39  ;;  %v119_v42 = vsub.s32 1, %v1389_v39  ;;  %896 = vmatpush3.bf16.msra.mxu0 %v1062_v8  ;;  %v1066_v12 = vld [vmem:[#allocation8 + $0x10] sm:$0xff]   ;;  %v671_v8 = vld [vmem:[#allocation10 + $0x38] sm:$0xff] }
  0x6a   :  { %419 = vmatpush1.bf16.msra.mxu1 %v1024_v13  ;;  %897 = vmatprep.subr.bf16.mxu0 %v1063_v9  ;;  %v1067_v13 = vld [vmem:[#allocation8 + $0x58] sm:$0xff]   ;;  %v670_v7 = vld [vmem:[#allocation10 + $0x30] sm:$0xff] }
  0x6b   :  { %420 = vmatprep.subr.bf16.mxu1 %v1025_v14  ;;  %v116_v43 = vrot.slane %v111_v41, %v1392_v40  ;;  %v120_v44 = vrot.slane %v111_v41, %v119_v42  ;;  %v1068_v14 = vld [vmem:[#allocation8 + $0x18] sm:$0xff]   ;;  %v979_v9 = vpack.c.bf16 %v671_v8, %v670_v7 }
  0x6d   :  { %898 = vmatpush3.bf16.msra.mxu0 %v1064_v10  ;;  %v672_v10 = vld [vmem:[#allocation10 + $0x40] sm:$0xff] }
  0x6e   :  { %421 = vmatpush1.bf16.msra.mxu1 %v1027_v15  ;;  %899 = vmatprep.subr.bf16.mxu0 %v1065_v11  ;;  %v1069_v15 = vld [vmem:[#allocation8 + $0x60] sm:$0xff]   ;;  %v673_v11 = vld [vmem:[#allocation10 + $0x48] sm:$0xff] }
  0x6f   :  { %422 = vmatprep.subr.bf16.mxu1 %v1028_v16  ;;  %v1070_v16 = vld [vmem:[#allocation8 + $0x20] sm:$0xff]  }
  0x71   :  { %900 = vmatpush3.bf16.msra.mxu0 %v1066_v12  ;;  %v982_v12 = vpack.c.bf16 %v673_v11, %v672_v10 }
  0x72   :  { %423 = vmatpush1.bf16.msra.mxu1 %v1030_v17  ;;  %901 = vmatprep.subr.bf16.mxu0 %v1067_v13  ;;  %v1071_v17 = vld [vmem:[#allocation8 + $0x68] sm:$0xff]   ;;  %v674_v13 = vld [vmem:[#allocation10 + $0x50] sm:$0xff] }
  0x73   :  { %424 = vmatprep.subr.bf16.mxu1 %v1031_v18  ;;  %v1072_v18 = vld [vmem:[#allocation8 + $0x28] sm:$0xff]  }
  0x75   :  { %902 = vmatpush3.bf16.msra.mxu0 %v1068_v14  ;;  %v675_v14 = vld [vmem:[#allocation10 + $0x58] sm:$0xff] }
  0x76   :  { %425 = vmatpush1.bf16.msra.mxu1 %v1033_v19  ;;  %903 = vmatprep.subr.bf16.mxu0 %v1069_v15  ;;  %v1073_v19 = vld [vmem:[#allocation8 + $0x70] sm:$0xff]   ;;  %v985_v15 = vpack.c.bf16 %v675_v14, %v674_v13 }
  0x77   :  { %426 = vmatprep.subr.bf16.mxu1 %v1034_v20  ;;  %v1074_v20 = vld [vmem:[#allocation8 + $0x30] sm:$0xff]  }
  0x79   :  { %904 = vmatpush3.bf16.msra.mxu0 %v1070_v16  ;;  %v676_v16 = vld [vmem:[#allocation10 + $0x60] sm:$0xff] }
  0x7a   :  { %427 = vmatpush1.bf16.msra.mxu1 %v1036_v21  ;;  %905 = vmatprep.subr.bf16.mxu0 %v1071_v17  ;;  %v1075_v21 = vld [vmem:[#allocation8 + $0x78] sm:$0xff]   ;;  %v677_v17 = vld [vmem:[#allocation10 + $0x68] sm:$0xff] }
  0x7b   :  { %428 = vmatprep.subr.bf16.mxu1 %v1037_v22  ;;  %v1076_v22 = vld [vmem:[#allocation8 + $0x38] sm:$0xff]  }
  0x7d   :  { %906 = vmatpush3.bf16.msra.mxu0 %v1072_v18  ;;  %v1251_v18 = vmov 0.0  }
  0x7e   :  { %429 = vmatpush1.bf16.msra.mxu1 %v1039_v23  ;;  %907 = vmatprep.subr.bf16.mxu0 %v1073_v19  ;;  %v240_v23 = vld [vmem:[%s1442_s4] sm:$0x3]  ;;  %v988_v19 = vpack.c.bf16 %v677_v17, %v676_v16 }
  0x7f   :  { %430 = vmatprep.subr.bf16.mxu1 %v1040_v24  ;;  %v245_v24 = vrot.slane %v240_v23, %v1392_v40 }
  0x81   :  { %908 = vmatpush3.bf16.msra.mxu0 %v1074_v20  ;;  %v678_v20 = vld [vmem:[#allocation10 + $0x70] sm:$0xff] }
  0x82   :  { %431 = vmatpush1.bf16.msra.mxu1 %v1042_v25  ;;  %909 = vmatprep.subr.bf16.mxu0 %v1075_v21  ;;  %v249_v25 = vrot.slane %v240_v23, %v119_v42  ;;  %v679_v21 = vld [vmem:[#allocation10 + $0x78] sm:$0xff] }
  0x83   :  { %432 = vmatprep.subr.bf16.mxu1 %v1043_v26 }
  0x85   :  { %910 = vmatpush3.bf16.msra.mxu0 %v1076_v22  ;;  %v991_v22 = vpack.c.bf16 %v679_v21, %v678_v20 }
  0x86   :  { %433 = vmatpush1.bf16.msra.mxu1 %v1045_v27 }
  0x87   :  { %434 = vmatprep.subr.bf16.mxu1 %v1046_v28 }
  0x8a   :  { %435 = vmatpush1.bf16.msra.mxu1 %v1048_v29 }
  0x8b   :  { %436 = vmatprep.subr.bf16.mxu1 %v1049_v30 }
  0x8e   :  { %437 = vmatpush1.bf16.msra.mxu1 %v1051_v31 }
  0x8f   :  { %438 = vmatprep.subr.bf16.mxu1 %v1052_v32 }
  0x92   :  { %439 = vmatpush1.bf16.msra.mxu1 %v1054_v33 }
  0x93   :  { %440 = vmatprep.subr.bf16.mxu1 %v1055_v34 }
  0x96   :  { %441 = vmatpush1.bf16.msra.mxu1 %v1057_v35 }
  0x97   :  { %442 = vmatprep.subr.bf16.mxu1 %v1058_v36 }
  0x9a   :  { %443 = vmatpush1.bf16.msra.mxu1 %v1060_v37 }
 0x136   :  { %v181_v45 = vpop.f32.mrb[0].mxu0 }
 0x137   :  { %v182_v46 = vadd.f32 %v181_v45, %v116_v43  ;;  %v183_v47 = vpop.f32.mrb[1].mxu0 }
 0x138   :  { %v184_v48 = vadd.f32 %v183_v47, %v120_v44  ;;  %v185_v49 = vpop.f32.mrb[2].mxu0 }
 0x139   :  { %v190_v50 = vmul.f32 0.044715, %v182_v46  ;;  %v186_v51 = vpop.f32.mrb[3].mxu0  ;;  %v188_v63 = vmul.f32 0.5, %v182_v46 }
 0x13a   :  { %v191_v52 = vmul.f32 0.044715, %v184_v48  ;;  %v189_v1 = vmul.f32 0.5, %v184_v48 }
 0x13b   :  { %v192_v53 = vmul.f32 %v190_v50, %v182_v46 }
 0x13c   :  { %v193_v54 = vmul.f32 %v191_v52, %v184_v48 }
 0x13d   :  { %v194_v55 = vmul.f32 %v192_v53, %v182_v46 }
 0x13e   :  { %v195_v56 = vmul.f32 %v193_v54, %v184_v48 }
 0x13f   :  { %v196_v57 = vadd.f32 %v194_v55, %v182_v46  ;;  %v876_v55 = vld [vmem:[%s1444_s6] ss:$0 sm:$0xff] }
 0x140   :  { %v197_v58 = vadd.f32 %v195_v56, %v184_v48 }
 0x141   :  { %v198_v59 = vmul.f32 0.7978846, %v196_v57 }
 0x142   :  { %v199_v60 = vmul.f32 0.7978846, %v197_v58 }
 0x143   :  { %1077 = vtanh.f32 %v198_v59 }
 0x144   :  { %1079 = vtanh.f32 %v199_v60 }
 0x14d   :  { %v1078_v61 = vpop.eup %1077 }
 0x14e   :  { %v1080_v62 = vpop.eup %1079  ;;  %v202_v0 = vadd.f32 1.0, %v1078_v61  ;;  %v664_v61 = vld [vmem:[#allocation10] sm:$0xff] }
 0x14f   :  { %v203_v2 = vadd.f32 1.0, %v1080_v62  ;;  %v665_v62 = vld [vmem:[#allocation10 + $0x8] sm:$0xff] }
 0x150   :  { %v204_v3 = vmul.f32 %v202_v0, %v188_v63  ;;  %v970_v63 = vpack.c.bf16 %v665_v62, %v664_v61  ;;  %v1249_v0 = vmov 0.0|0.0  }
 0x151   :  { %v205_v4 = vmul.f32 %v203_v2, %v189_v1  ;;  %969 = vmatprep.subr.bf16.mxu0 %v1249_v0  ;;  %v666_v1 = vld [vmem:[#allocation10 + $0x10] sm:$0xff]  ;;  %v667_v2 = vld [vmem:[#allocation10 + $0x18] sm:$0xff] }
 0x152   :  { %v206_v6 = vpack.c.bf16 %v204_v3, %v204_v3  ;;  %v973_v3 = vpack.c.bf16 %v667_v2, %v666_v1 }
 0x153   :  { %v207_v5 = vpack.c.bf16 %v205_v4, %v205_v4  ;;  %v668_v4 = vld [vmem:[#allocation10 + $0x20] sm:$0xff] }
 0x155   :  { %444 = vmatprep.mubr.bf16.mxu1 %v207_v5  ;;  %v669_v5 = vld [vmem:[#allocation10 + $0x28] sm:$0xff] }
 0x156   :  { %445 = vmatmul.mubr.bf16.vlgmr.msra.gmra.mrb[0].mxu1 %v206_v6  ;;  %v976_v6 = vpack.c.bf16 %v669_v5, %v668_v4 }
 0x229   :  { %v446_v26 = vpop.f32.mrb[0].mxu1 }
 0x22a   :  { %v447_v27 = vadd.f32 %v446_v26, %v245_v24  ;;  %v448_v28 = vpop.f32.mrb[1].mxu1 }
 0x22b   :  { %v449_v29 = vadd.f32 %v448_v28, %v249_v25  ;;  %v450_v30 = vpop.f32.mrb[2].mxu1 }
 0x22c   :  { %v455_v31 = vmul.f32 0.044715, %v447_v27  ;;  %v451_v32 = vpop.f32.mrb[3].mxu1  ;;  %v453_v45 = vmul.f32 0.5, %v447_v27 }
 0x22d   :  { %v456_v33 = vmul.f32 0.044715, %v449_v29  ;;  %v454_v47 = vmul.f32 0.5, %v449_v29 }
 0x22e   :  { %v457_v34 = vmul.f32 %v455_v31, %v447_v27 }
 0x22f   :  { %v458_v35 = vmul.f32 %v456_v33, %v449_v29 }
 0x230   :  { %v459_v36 = vmul.f32 %v457_v34, %v447_v27 }
 0x231   :  { %v460_v37 = vmul.f32 %v458_v35, %v449_v29 }
 0x232   :  { %v461_v38 = vadd.f32 %v459_v36, %v447_v27 }
 0x233   :  { %v462_v41 = vadd.f32 %v460_v37, %v449_v29 }
 0x234   :  { %v463_v43 = vmul.f32 0.7978846, %v461_v38 }
 0x235   :  { %v464_v44 = vmul.f32 0.7978846, %v462_v41  ;;  %v893_v41 = vld [vmem:[%s1448_s10] ss:$0 sm:$0xff] }
 0x236   :  { %1081 = vtanh.f32 %v463_v43 }
 0x237   :  { %1083 = vtanh.f32 %v464_v44 }
 0x240   :  { %v1082_v39 = vpop.eup %1081 }
 0x241   :  { %v1084_v42 = vpop.eup %1083  ;;  %v467_v46 = vadd.f32 1.0, %v1082_v39  ;;  %v755_v39 = vld [vmem:[%s1447_s9] sm:$0x1] }
 0x242   :  { %v468_v48 = vadd.f32 1.0, %v1084_v42 }
 0x243   :  { %v469_v49 = vmul.f32 %v467_v46, %v453_v45 }
 0x244   :  { %v470_v50 = vmul.f32 %v468_v48, %v454_v47  ;;  %v792_v47 = vmul.f32 %v755_v39, %v755_v39 }
 0x245   :  { %v471_v52 = vpack.c.bf16 %v469_v49, %v469_v49 }
 0x246   :  { %v472_v51 = vpack.c.bf16 %v470_v50, %v470_v50  ;;  %v787_v50 = vrot.slane %v755_v39, %v1392_v40 }
 0x248   :  { %640 = vmatprep.mubr.bf16.mxu0 %v472_v51 }
 0x249   :  { %641 = vmatmul.mubr.bf16.vlgmr.msra.gmra.mrb[4].mxu0 %v471_v52 }
 0x24a   :  { %971 = vmatpush3.bf16.msra.mxu0 %v970_v63  ;;  %966 = vmatprep.mubr.msk.f32.mxu0 %vm1250_vm1, %v1251_v18 }
 0x24b   :  { %972 = vmatprep.subr.bf16.mxu0 %v1249_v0 }
 0x24e   :  { %974 = vmatpush3.bf16.msra.mxu0 %v973_v3 }
 0x24f   :  { %975 = vmatprep.subr.bf16.mxu0 %v1249_v0 }
 0x252   :  { %977 = vmatpush3.bf16.msra.mxu0 %v976_v6 }
 0x253   :  { %978 = vmatprep.subr.bf16.mxu0 %v1249_v0 }
 0x256   :  { %980 = vmatpush3.bf16.msra.mxu0 %v979_v9 }
 0x257   :  { %981 = vmatprep.subr.bf16.mxu0 %v1249_v0 }
 0x25a   :  { %983 = vmatpush3.bf16.msra.mxu0 %v982_v12 }
 0x25b   :  { %984 = vmatprep.subr.bf16.mxu0 %v1249_v0 }
 0x25e   :  { %986 = vmatpush3.bf16.msra.mxu0 %v985_v15 }
 0x25f   :  { %987 = vmatprep.subr.bf16.mxu0 %v1249_v0 }
 0x262   :  { %989 = vmatpush3.bf16.msra.mxu0 %v988_v19 }
 0x263   :  { %990 = vmatprep.subr.bf16.mxu0 %v1249_v0 }
 0x266   :  { %992 = vmatpush3.bf16.msra.mxu0 %v991_v22 }
 0x31c   :  { %v911_v53 = vpop.f32.mrb[4].mxu0 }
 0x31d   :  { %v912_v54 = vpop.f32.mrb[5].mxu0 }
 0x31e   :  { %v913_v56 = vadd.f32 %v912_v54, %v911_v53  ;;  %v914_v57 = vpop.f32.mrb[6].mxu0  ;;  %v894_v54 = vld [vmem:[%s1446_s8] ss:$0 sm:$0xff]  ;;  %s1252_s8 = smov [#allocation11]  }
 0x31f   :  { %v915_v58 = vpop.f32.mrb[7].mxu0  ;;  %s828_s9 = sshll.u32 %s1252_s8, 4  ;;  %s829_s9 = int_to_ptr.vmem [resolvable:$true] %s828_s9 }
 0x320   :  { %v1410_v59 = vadd.f32 %v913_v56, %v876_v55  ;;  %v797_v55 = vrot.slane %v792_v47, %v1392_v40  ;;  %s1209_s10 = scalar_lea.vmem %s829_s9, 128  ;;  %p1214_p13 = scmp.lt.s32.totalorder %s829_s9, %s829_s9 }
 0x321   :  { %p1210_p12 = scmp.ne.s32.totalorder %s829_s9, %s1209_s10  ;;  %p1215_p0 = scmp.lt.s32.totalorder %s1209_s10, %s1209_s10 }
 0x322   :  { %v648_v60 = vmul.f32 %v1410_v59, %v1410_v59 }
 0x323   :  { %p1216_p1 = por %p1215_p0, %p1214_p13 }
 0x324   :  { %649 = vadd.xlane.f32.xlu0 %v648_v60 }
 0x325   :  { %p1217_p2 = pnand %p1216_p1, %p1210_p12 }
 0x3b1   :  { %v650_v23 = vpop.xlane.xlu0 %649 }
 0x3b2   :  { %1085 = vrsqrt.f32 %v650_v23  ;;  %vm653_vm2 = vcmp.eq.f32.partialorder %v650_v23, inf  ;;  %v656_v26 = vand.u32 2147483648, %v650_v23  ;;  %vm655_vm3 = vcmp.eq.f32.partialorder %v650_v23, 0.0 }
 0x3bc   :  { %v1086_v24 = vpop.eup %1085 }
 0x3bd   :  { %v652_v25 = vmul.f32 %v1086_v24, %v650_v23 }
 0x3bf   :  { %v654_v27 = vsel %vm653_vm2, %v650_v23, %v652_v25 }
 0x3c0   :  { %v657_v28 = vsel %vm655_vm3, %v656_v26, %v654_v27 }
 0x3c1   :  { %v658_v29 = vmax.f32 %v657_v28, 1e-15 }
 0x3c3   :  { %v659_v30 = vmul.f32 1.7320508, %v658_v29 }
 0x3c5   :  { %1087 = vtanh.f32 %v659_v30 }
 0x3c6   :  { %1089 = vrcp.f32 %v659_v30 }
 0x3cf   :  { %v1088_v31 = vpop.eup %1087 }
 0x3d0   :  { %v1090_v32 = vpop.eup %1089 }
 0x3d1   :  { %v662_v33 = vmul.f32 %v1090_v32, %v1088_v31 }
 0x3d3   :  { %v663_v34 = vmul.f32 %v662_v33, %v1410_v59 }
 0x3d5   :  { %967 = vmatmul.mubr.f32.vlgmr.msra.gmra.mrb[8].mxu0 %v663_v34  ;;  %v751_v35 = vmul.f32 %v663_v34, %v663_v34 }
 0x3d7   :  { %752 = vadd.xlane.f32.xlu0 %v751_v35 }
 0x464   :  { %v753_v43 = vpop.xlane.xlu0 %752 }
 0x465   :  { %v758_v42 = vmul.f32 3.0, %v753_v43  ;;  %v767_v45 = vmul.f32 %v893_v41, %v753_v43  ;;  %v799_v59 = vmul.f32 %v797_v55, %v753_v43 }
 0x4a8   :  { %v746_v36 = vpop.f32.mrb[8].mxu0 }
 0x4a9   :  { %v750_v37 = vsub.f32 0.0, %v746_v36  ;;  %v968_v38 = vpop.f32.mrb[9].mxu0 }
 0x4ab   :  { %v756_v44 = vmul.f32 6.0, %v750_v37 }
 0x4ad   :  { %v757_v46 = vadd.f32 1.0, %v756_v44 }
 0x4af   :  { %v759_v48 = vadd.f32 %v758_v42, %v757_v46  ;;  %v768_v49 = vadd.f32 %v767_v45, %v757_v46 }
 0x4b1   :  { %v769_v51 = vmax.f32 %v768_v49, 1e-15  ;;  %v774_v52 = vmul.f32 %v759_v48, %v759_v48  ;;  %v782_v53 = vmul.f32 2.0, %v759_v48 }
 0x4b3   :  { %v789_v56 = vmul.f32 %v787_v50, %v782_v53  ;;  %1091 = vrcp.f32 %v769_v51  ;;  %v781_v57 = vmul.f32 %v894_v54, %v774_v52 }
 0x4b5   :  { %v790_v58 = vmul.f32 %v789_v56, %v750_v37 }
 0x4b7   :  { %v791_v60 = vadd.f32 %v790_v58, %v781_v57 }
 0x4b9   :  { %v800_v61 = vadd.f32 %v799_v59, %v791_v60 }
 0x4bb   :  { %v801_v62 = vmax.f32 %v800_v61, 0.0 }
 0x4bd   :  { %1093 = vrsqrt.f32 %v801_v62  ;;  %v1092_v63 = vpop.eup %1091  ;;  %vm804_vm4 = vcmp.eq.f32.partialorder %v801_v62, inf  ;;  %v807_v4 = vand.u32 2147483648, %v801_v62  ;;  %vm806_vm5 = vcmp.eq.f32.partialorder %v801_v62, 0.0 }
 0x4be   :  { %v771_v0 = vmul.f32 %v1092_v63, %v769_v51 }
 0x4c0   :  { %v772_v1 = vsub.f32 2.0, %v771_v0 }
 0x4c2   :  { %v773_v5 = vmul.f32 %v1092_v63, %v772_v1 }
 0x4c7   :  { %v1094_v2 = vpop.eup %1093 }
 0x4c8   :  { %v803_v3 = vmul.f32 %v1094_v2, %v801_v62 }
 0x4ca   :  { %v805_v6 = vsel %vm804_vm4, %v801_v62, %v803_v3 }
 0x4cb   :  { %v808_v40 = vsel %vm806_vm5, %v807_v4, %v805_v6 }
 0x4cc   :  { %v809_v7 = vmul.f32 %v808_v40, %v773_v5 }
 0x4ce   :  { %v810_v8 = vmul.f32 1.7320508, %v809_v7 }
 0x4d0   :  { %v811_v9 = vmax.f32 %v810_v8, 0.0 }
 0x4d2   :  { %v812_v10 = vmin.f32 %v811_v9, 0.9999999 }
 0x4d4   :  { %v814_v11 = vsub.f32 1.0, %v812_v10  ;;  %v813_v12 = vadd.f32 1.0, %v812_v10 }
 0x4d6   :  { %1095 = vrcp.f32 %v814_v11 }
 0x4e0   :  { %v1096_v13 = vpop.eup %1095 }
 0x4e1   :  { %v816_v14 = vmul.f32 %v1096_v13, %v813_v12 }
 0x4e3   :  { %1097 = vlog2.f32 %v816_v14 }
 0x4ed   :  { %v1098_v15 = vpop.eup %1097 }
 0x4ee   :  { %v818_v16 = vmul.f32 0.6931472, %v1098_v15 }
 0x4f0   :  { %v819_v17 = vmul.f32 0.57735026, %v818_v16 }
 0x4f2   :  { %v820_v18 = vmul.f32 -10.0, %v819_v17 }
 0x4f4   :  { %821 = vst [vmem:[#allocation11] sm:$0xff] %v820_v18 }
 0x4f5   :  { %1220 = shalt.err (!%p1217_p2)
}
 0x4f6   :  { %s1221_s26 = scalar_lea.hbm %s1449_s11, 128 }
 0x4f7   :  { %p1222_p3 = scmp.ne.s32.totalorder %s1449_s11, %s1221_s26  ;;  %p1225_p4 = scmp.lt.u32.totalorder %s1221_s26, %s1449_s11 }
 0x4f9   :  { %p1227_p5 = pnand %p1225_p4, %p1222_p3 }
 0x4fb   :  { %1230 = shalt.err (!%p1227_p5)
}
 0x4fc   :  { %831 = dma.vmem_to_hbm [thread:$0]  %s829_s9, 128, %s1449_s11, [#allocation4]  }
 0x4fd   :  { %1237 = dma.done.wait [#allocation4], 128  }
 0x4fe   :  { %1238 = vsyncadd [#allocation4], 4294967168 }
 0x4ff   :  { %835 = vsyncpa [#allocation3], 1 }
 0x500   :  { %836 = vsyncpa [#allocation6], 1 }
 0x501   :  { %837 = vsyncpa [#allocation9], 1 }
 0x502   :  { %838 = vsyncpa [#allocation4], 1 }

</bundles_post_ra>
